<compile_context>
chip_gen: v7x
topology: tpu7x:2x2x1
jax: 0.10.0
libtpu: 0.0.40
codegen_flags: <defaults>
</compile_context>

<pallas_src>
import functools

import jax
import jax.numpy as jnp
from jax.experimental import pallas as pl
from jax.experimental.pallas import tpu as pltpu


def _contrastive_loss_kernel(a_ref, p_ref, n_ref, out_ref, *,
                             margin, fold, feat, n_rows, tr):
    """One grid step: partial hinge sum for a (tr, width) row tile.

    When fold > 1 the inputs were lane-folded in the wrapper: each 128-lane
    row packs `fold` consecutive samples of `feat` features each, and the
    per-sample reduce is done with `fold` static lane-slice reductions.
    """
    i = pl.program_id(0)

    a = a_ref[...].astype(jnp.float32)
    p = p_ref[...].astype(jnp.float32)
    n = n_ref[...].astype(jnp.float32)

    # (a - p)^2 - (a - n)^2 == (p - n) * (p + n - 2a)   (the ||a||^2 cancels)
    prod = (p - n) * (p + n - 2.0 * a)

    if fold > 1:
        cols = [jnp.sum(prod[:, s * feat:(s + 1) * feat], axis=1, keepdims=True)
                for s in range(fold)]
        per_sample = jnp.concatenate(cols, axis=1)            # (tr, fold)
    else:
        per_sample = jnp.sum(prod, axis=1, keepdims=True)     # (tr, 1)

    hinge = jnp.maximum(per_sample + jnp.float32(margin), 0.0)

    if n_rows % tr != 0:
        # Zero contributions from rows padded past the true (folded) row count
        # (padded block rows can hold garbage; jnp.where drops it safely).
        row = i * tr + jax.lax.broadcasted_iota(jnp.int32, hinge.shape, 0)
        hinge = jnp.where(row < n_rows, hinge, 0.0)

    partial = jnp.sum(hinge)
    # (8, 128)-aligned output block so stores stay layout-friendly on every
    # generation; the wrapper reads element [0, 0] of each block.
    out_ref[...] = jnp.broadcast_to(partial, (8, 128))


def contrastive_loss_ref(anchor, positive, negative, margin=1.0):
    """Pure-JAX reference (also used as the small-problem fallback)."""
    d_ap = jnp.sum((anchor - positive) ** 2, axis=1)
    d_an = jnp.sum((anchor - negative) ** 2, axis=1)
    return jnp.mean(jnp.maximum(d_ap - d_an + margin, 0.0))


def contrastive_loss(anchor, positive, negative, margin=1.0, *,
                     block_rows=None, min_pallas_bytes=256 * 1024):
    """Triplet contrastive loss. anchor/positive/negative: (B, D). Returns scalar f32."""
    assert anchor.shape == positive.shape == negative.shape
    assert anchor.ndim == 2
    B, D = anchor.shape
    itemsize = jnp.dtype(anchor.dtype).itemsize

    # Small-problem fallback: a fused XLA elementwise+reduce beats the fixed
    # pallas_call launch / single-step pipeline overhead at tiny sizes.
    if 3 * B * D * itemsize < min_pallas_bytes:
        return contrastive_loss_ref(anchor, positive, negative, margin)

    # Lane folding: for D < 128 pack 128/D samples per 128-lane row via a
    # free row-major reshape (only when B divides evenly -> no pad copy).
    fold = 1
    a2, p2, n2 = anchor, positive, negative
    if 0 < D < 128 and 128 % D == 0 and B % (128 // D) == 0:
        fold = 128 // D
        a2 = anchor.reshape(B // fold, 128)
        p2 = positive.reshape(B // fold, 128)
        n2 = negative.reshape(B // fold, 128)

    n_rows, width = a2.shape

    # Sublane packing multiple for the input dtype (f32: 8, bf16: 16, 8-bit: 32).
    sub = {4: 8, 2: 16, 1: 32}.get(itemsize, 8)

    # Row tile: ~2-4 MiB of DMA per input per step, under a VMEM working-set
    # budget that counts 3 double-buffered input tiles plus ~4 f32 temporaries.
    # TODO(synk): very large D would want a 2-D (rows, feature) grid with a
    # per-row accumulator instead of a single row-tile axis.
    target_bytes = 4 * 1024 * 1024
    vmem_budget = 20 * 1024 * 1024
    per_row_dma = width * itemsize
    per_row_vmem = width * (3 * 2 * itemsize + 4 * 4)
    tr = min(target_bytes // per_row_dma, vmem_budget // per_row_vmem)
    if block_rows is not None:
        tr = block_rows
    tr = max(sub, (tr // sub) * sub)
    tr = min(tr, pl.cdiv(n_rows, sub) * sub)   # do not tile past the batch

    num_tiles = pl.cdiv(n_rows, tr)

    kernel = functools.partial(
        _contrastive_loss_kernel, margin=float(margin), fold=fold,
        feat=D, n_rows=n_rows, tr=tr)

    partials = pl.pallas_call(
        kernel,
        out_shape=jax.ShapeDtypeStruct((num_tiles * 8, 128), jnp.float32),
        grid=(num_tiles,),
        in_specs=[
            pl.BlockSpec((tr, width), lambda i: (i, 0)),
            pl.BlockSpec((tr, width), lambda i: (i, 0)),
            pl.BlockSpec((tr, width), lambda i: (i, 0)),
        ],
        out_specs=pl.BlockSpec((8, 128), lambda i: (i, 0)),
        compiler_params=pltpu.CompilerParams(
            # Per-tile partial sums are independent -> megacore-shardable on v7x.
            dimension_semantics=("parallel",),
            vmem_limit_bytes=40 * 1024 * 1024,
        ),
    )(a2, p2, n2)

    # Final reduction of per-tile partials in the wrapper (also avoids the
    # linear f32 error growth of a single serial scalar accumulator).
    per_tile = partials.reshape(num_tiles, 8, 128)[:, 0, 0]
    return jnp.sum(per_tile) / jnp.float32(B)


if __name__ == "__main__":
    key = jax.random.PRNGKey(0)

    def make(b, d, dtype=jnp.float32):
        ka, kp, kn = jax.random.split(jax.random.fold_in(key, b * 1000 + d), 3)
        a = jax.random.normal(ka, (b, d), dtype=jnp.float32).astype(dtype)
        p = jax.random.normal(kp, (b, d), dtype=jnp.float32).astype(dtype)
        n = jax.random.normal(kn, (b, d), dtype=jnp.float32).astype(dtype)
        return a, p, n

    # 1) Tiny problem (matches the PyTorch module's typical usage):
    #    exercises the small-problem XLA fallback path.
    a, p, n = make(8, 32)
    out = jax.block_until_ready(contrastive_loss(a, p, n, margin=1.0))
    ref = contrastive_loss_ref(a, p, n, margin=1.0)
    assert jnp.allclose(out, ref, rtol=1e-4, atol=1e-4), ("tiny", out, ref)

    # 2) Lane-folded Pallas path (D=32 -> 4 samples per 128-lane row),
    #    multiple grid tiles / parallel per-tile partial sums.
    a, p, n = make(512, 32)
    out = jax.block_until_ready(
        contrastive_loss(a, p, n, margin=1.0, block_rows=32, min_pallas_bytes=0))
    ref = contrastive_loss_ref(a, p, n, margin=1.0)
    assert jnp.allclose(out, ref, rtol=1e-4, atol=1e-4), ("folded", out, ref)

    # 3) Unfolded Pallas path with a ragged batch (row masking on the last tile).
    a, p, n = make(203, 128)
    out = jax.block_until_ready(
        contrastive_loss(a, p, n, margin=1.0, block_rows=64, min_pallas_bytes=0))
    ref = contrastive_loss_ref(a, p, n, margin=1.0)
    assert jnp.allclose(out, ref, rtol=1e-4, atol=1e-4), ("masked", out, ref)

    # 4) bf16 inputs (16-row sublane alignment), folded path, default tiling.
    a, p, n = make(256, 64, jnp.bfloat16)
    out = jax.block_until_ready(
        contrastive_loss(a, p, n, margin=1.0, min_pallas_bytes=0))
    ref = contrastive_loss_ref(a.astype(jnp.float32), p.astype(jnp.float32),
                               n.astype(jnp.float32), margin=1.0)
    assert jnp.allclose(out, ref, rtol=1e-3, atol=1e-3), ("bf16", out, ref)

    print("KERNEL_OK")
</pallas_src>

<mosaic_0001>
module attributes {stable_mosaic.version = 11 : i64} {
  func.func @_contrastive_loss_kernel(%arg0: i32, %arg1: memref<32x128xf32, #tpu.memory_space<vmem>>, %arg2: memref<32x128xf32, #tpu.memory_space<vmem>>, %arg3: memref<32x128xf32, #tpu.memory_space<vmem>>, %arg4: memref<8x128xf32, #tpu.memory_space<vmem>>) attributes {dimension_semantics = [#tpu.dimension_semantics<parallel>], iteration_bounds = array<i64: 4>, scalar_prefetch = 0 : i64, scratch_operands = 0 : i64, tpu.core_type = #tpu.core_type<tc>, window_params = [{transform_indices = @transform_0, window_bounds = array<i64: 32, 128>}, {transform_indices = @transform_1, window_bounds = array<i64: 32, 128>}, {transform_indices = @transform_2, window_bounds = array<i64: 32, 128>}, {transform_indices = @transform_3, window_bounds = array<i64: 8, 128>}]} {
    %c0 = arith.constant 0 : index
    %c0_0 = arith.constant 0 : index
    %0 = vector.load %arg1[%c0, %c0_0] : memref<32x128xf32, #tpu.memory_space<vmem>>, vector<32x128xf32>
    %c0_1 = arith.constant 0 : index
    %c0_2 = arith.constant 0 : index
    %1 = vector.load %arg2[%c0_1, %c0_2] : memref<32x128xf32, #tpu.memory_space<vmem>>, vector<32x128xf32>
    %c0_3 = arith.constant 0 : index
    %c0_4 = arith.constant 0 : index
    %2 = vector.load %arg3[%c0_3, %c0_4] : memref<32x128xf32, #tpu.memory_space<vmem>>, vector<32x128xf32>
    %3 = arith.subf %1, %2 : vector<32x128xf32>
    %4 = arith.addf %1, %2 : vector<32x128xf32>
    %cst = arith.constant 2.000000e+00 : f32
    %5 = vector.broadcast %cst : f32 to vector<32x128xf32>
    %6 = arith.mulf %5, %0 : vector<32x128xf32>
    %7 = arith.subf %4, %6 : vector<32x128xf32>
    %8 = arith.mulf %3, %7 : vector<32x128xf32>
    %9 = vector.extract_strided_slice %8 {offsets = [0, 0], sizes = [32, 32], strides = [1, 1]} : vector<32x128xf32> to vector<32x32xf32>
    %cst_5 = arith.constant dense<0.000000e+00> : vector<32xf32>
    %10 = vector.multi_reduction <add>, %9, %cst_5 [1] : vector<32x32xf32> to vector<32xf32>
    %11 = vector.shape_cast %10 : vector<32xf32> to vector<32x1xf32>
    %12 = vector.extract_strided_slice %8 {offsets = [0, 32], sizes = [32, 32], strides = [1, 1]} : vector<32x128xf32> to vector<32x32xf32>
    %cst_6 = arith.constant dense<0.000000e+00> : vector<32xf32>
    %13 = vector.multi_reduction <add>, %12, %cst_6 [1] : vector<32x32xf32> to vector<32xf32>
    %14 = vector.shape_cast %13 : vector<32xf32> to vector<32x1xf32>
    %15 = vector.extract_strided_slice %8 {offsets = [0, 64], sizes = [32, 32], strides = [1, 1]} : vector<32x128xf32> to vector<32x32xf32>
    %cst_7 = arith.constant dense<0.000000e+00> : vector<32xf32>
    %16 = vector.multi_reduction <add>, %15, %cst_7 [1] : vector<32x32xf32> to vector<32xf32>
    %17 = vector.shape_cast %16 : vector<32xf32> to vector<32x1xf32>
    %18 = vector.extract_strided_slice %8 {offsets = [0, 96], sizes = [32, 32], strides = [1, 1]} : vector<32x128xf32> to vector<32x32xf32>
    %cst_8 = arith.constant dense<0.000000e+00> : vector<32xf32>
    %19 = vector.multi_reduction <add>, %18, %cst_8 [1] : vector<32x32xf32> to vector<32xf32>
    %20 = vector.shape_cast %19 : vector<32xf32> to vector<32x1xf32>
    %21 = tpu.concatenate %11, %14, %17, %20 in 1 : vector<32x1xf32>, vector<32x1xf32>, vector<32x1xf32>, vector<32x1xf32> -> vector<32x4xf32>
    %cst_9 = arith.constant 1.000000e+00 : f32
    %22 = vector.broadcast %cst_9 : f32 to vector<32x4xf32>
    %23 = arith.addf %21, %22 : vector<32x4xf32>
    %cst_10 = arith.constant 0.000000e+00 : f32
    %24 = vector.broadcast %cst_10 : f32 to vector<32x4xf32>
    %25 = arith.maximumf %23, %24 : vector<32x4xf32>
    %26 = vector.shape_cast %25 : vector<32x4xf32> to vector<1x32x4xf32>
    %cst_11 = arith.constant dense<0.000000e+00> : vector<1xf32>
    %27 = vector.multi_reduction <add>, %26, %cst_11 [1, 2] : vector<1x32x4xf32> to vector<1xf32>
    %28 = vector.shape_cast %27 : vector<1xf32> to vector<1x1x1xf32>
    %29 = vector.extract %28[0, 0, 0] : f32 from vector<1x1x1xf32>
    %30 = vector.broadcast %29 : f32 to vector<8x128xf32>
    %c0_12 = arith.constant 0 : index
    %c0_13 = arith.constant 0 : index
    %31 = vector.load %arg4[%c0_12, %c0_13] : memref<8x128xf32, #tpu.memory_space<vmem>>, vector<8x128xf32>
    tpu.vector_store %arg4[%c0_12, %c0_13], %30 {strides = array<i32>} : memref<8x128xf32, #tpu.memory_space<vmem>>, vector<8x128xf32>,
    return
  }
  func.func @transform_0(%arg0: i32) -> (i32, i32) {
    %c0_i32 = arith.constant 0 : i32
    %c0_i32_0 = arith.constant 0 : i32
    return %arg0, %c0_i32 : i32, i32
  }
  func.func @transform_1(%arg0: i32) -> (i32, i32) {
    %c0_i32 = arith.constant 0 : i32
    %c0_i32_0 = arith.constant 0 : i32
    return %arg0, %c0_i32 : i32, i32
  }
  func.func @transform_2(%arg0: i32) -> (i32, i32) {
    %c0_i32 = arith.constant 0 : i32
    %c0_i32_0 = arith.constant 0 : i32
    return %arg0, %c0_i32 : i32, i32
  }
  func.func @transform_3(%arg0: i32) -> (i32, i32) {
    %c0_i32 = arith.constant 0 : i32
    %c0_i32_0 = arith.constant 0 : i32
    return %arg0, %c0_i32 : i32, i32
  }
}

</mosaic_0001>

<bundles_post_ra>
// kernel: tpu_custom_call.1
= control target key start
LH: loop header
LB: loop body
LE: loop exit
PB: predicated region body
PF: predicated region fallthrough
CT: control target
= control target key end

     0   :  { %s1129_s0 = inlined_call_operand.hbm [shape: f32[128,128], index: 0, kind: input, shape index: {}]   ;;  %s1130_s1 = inlined_call_operand.hbm [shape: f32[128,128], index: 1, kind: input, shape index: {}]   ;;  %s1131_s2 = inlined_call_operand.hbm [shape: f32[128,128], index: 2, kind: input, shape index: {}]   ;;  %s1132_s3 = inlined_call_operand.hbm [shape: f32[32,128], index: 3, kind: output, shape index: {}]  }
   0x1   :  { %1139 = sst [smem:[#allocation12_spill]] %s1129_s0 }
   0x2   :  { %8 = vsyncpa [#allocation3], 0 }
   0x3   :  { %10 = vsyncpa [#allocation3 + $0x1], 0 }
   0x4   :  { %11 = vsyncpa [#allocation6], 0 }
   0x5   :  { %13 = vsyncpa [#allocation6 + $0x1], 0 }
   0x6   :  { %14 = vsyncpa [#allocation4], 0 }
   0x7   :  { %16 = vsyncpa [#allocation4 + $0x1], 0  ;;  %s837_s12 = smov 0   ;;  %s839_s13 = smov 0  }
   0x8   :  { %s841_s14 = smov 0   ;;  %s843_s15 = smov 0  }
   0x9 LB: > { %s858_s16 = sadd.s32 4294967295, %s806_s15   ;;  %s559_s17 = sadd.s32 4294967294, %s806_s15   ;;  %s806_s15 = sphi %s843_s15, %s1157_s15   ;;  %s802_s14 = sphi %s841_s14, %s1156_s14   ;;  %s798_s13 = sphi %s839_s13, %s1155_s13   ;;  %s794_s12 = sphi %s837_s12, %s1154_s12  }
   0xa   : > { %s862_s18 = sadd.s32 1, %s806_s15   ;;  %s29_s19 = sadd.s32 1, %s802_s14 }
   0xb   : > { %s26_s20 = ssub.s32 %s806_s15, %s862_s18  ;;  %p36_p0 = scmp.ne.s32.totalorder %s802_s14, %s798_s13 }
   0xc   : > { %p27_p1 = scmp.eq.s32.totalorder %s26_s20, 0  ;;  %p37_p2 = scmp.eq.s32.totalorder %s806_s15, 0 }
   0xd   : > { %p42_p3 = scmp.ne.s32.totalorder %s798_s13, %s794_s12  ;;  %p43_p4 = scmp.eq.s32.totalorder %s858_s16, 0 }
   0xe   : > { %s874_s21 = scalar_select %p27_p1, %s802_s14, %s29_s19  }
   0xf   : > { %p38_p5 = por %p37_p2, %p36_p0  ;;  %p876_p6 = por %p43_p4, %p42_p3 }
  0x10   : > { %p118_p7 = scmp.eq.s32.totalorder %s858_s16, 3  ;;  %p124_p8 = scmp.eq.s32.totalorder %s559_s17, 3 }
  0x11   : > { %s1140_s22 = scalar_select %p876_p6, 1, 0 }
  0x12   : > { %p607_p9 = scmp.lt.s32.totalorder %s806_s15, 4  ;;  %p882_p10 = por %p118_p7, %p36_p0 }
  0x13   : > { %p886_p11 = por %p124_p8, %p42_p3  ;;  %s144_s25 = sand.u32 1, %s802_s14  }
  0x14   : > { %s1141_s23 = scalar_select %p882_p10, 1, 0 }
  0x15   : > { %s1142_s24 = scalar_select %p886_p11, 1, 0 }
  0x16   : > { %s892_s26 = sshll.u32 %s806_s15, 9  ;;  %s896_s27 = sshll.u32 %s144_s25, 5 }
  0x17   : > { %p898_p12 = pnand %p607_p9, %p38_p5  ;;  %s165_s29 = sand.u32 1, %s806_s15  }
  0x18   : > { %s907_s5 = scalar_lea.hbm %s1130_s1, %s892_s26  ;;  %s169_s6 = scalar_lea.vmem [#allocation5], %s896_s27 }
  0x19   : > { %s176_s7 = sshll.u32 %s169_s6, 4  ;;  %s913_s8 = scalar_lea.sflag [#allocation6], %s165_s29  ;;  %s910_s7 = int_to_ptr.vmem [resolvable:$true] %s176_s7 }
  0x1a   : > { %s646_s9 = scalar_lea.hbm %s907_s5, 512  ;;  %p919_p1 = pneg %p898_p12 }
  0x1b   : > { %p647_p0 = scmp.ne.s32.totalorder %s907_s5, %s646_s9  ;;  %s651_s19 = scalar_lea.hbm %s1130_s1, 2048 }
  0x1c   : > { %p652_p4 = scmp.lt.u32.totalorder %s907_s5, %s1130_s1  ;;  %p653_p5 = scmp.lt.u32.totalorder %s651_s19, %s646_s9 }
  0x1d   : > { %p649_p2 = pnand %p919_p1, %p647_p0  ;;  %p655_p8 = scmp.lt.u32.totalorder %s646_s9, %s907_s5 }
  0x1e   : > { %p654_p7 = por %p653_p5, %p652_p4 }
  0x1f   : > { %p650_p3 = pneg %p649_p2 }
  0x20   : > { %p656_p9 = por %p655_p8, %p654_p7 }
  0x22   : > { %p657_p13 = pnand %p656_p9, %p650_p3 }
  0x24   : > { %660 = shalt.err (!%p657_p13)
}
  0x25   : > { %s661_s29 = scalar_lea.vmem %s910_s7, 512  ;;  %s808_s4 = smov [#allocation5]  }
  0x26   : > { %p662_p0 = scmp.ne.s32.totalorder %s910_s7, %s661_s29  ;;  %s666_s6 = sshll.u32 %s808_s4, 4  ;;  %s667_s6 = int_to_ptr.vmem [resolvable:$false] %s666_s6 }
  0x27   : > { %s668_s11 = scalar_lea.vmem %s667_s6, 1024  ;;  %p669_p10 = scmp.lt.s32.totalorder %s910_s7, %s667_s6 }
  0x28   : > { %p664_p2 = pnand %p662_p0, %p919_p1  ;;  %p670_p6 = scmp.lt.s32.totalorder %s668_s11, %s661_s29 }
  0x2a   : > { %p665_p11 = pneg %p664_p2  ;;  %p671_p4 = por %p670_p6, %p669_p10 }
  0x2c   : > { %p672_p5 = pnand %p671_p4, %p665_p11 }
  0x2e   : > { %675 = shalt.err (!%p672_p5)
}
  0x2f   : > { %s1135_s9 = smov 128   ;;  %s1137_s17 = smov 8  }
  0x30   : > { %599 = dma.hbm_to_vmem [thread:$0]  (!%p898_p12), %s907_s5, 512, %s910_s7, %s913_s8, %s1135_s9, %s1135_s9, %s1137_s17  }
  0x31   : > { %p205_p6 = scmp.lt.s32.totalorder %s806_s15, 5  ;;  %s1145_s0 = sld [smem:[#allocation12_spill]] }
  0x32   : > { %p1146_p10 = scmp.ge.s32.totalorder %s806_s15, 1  ;;  %s148_s4 = scalar_lea.vmem [#allocation2], %s896_s27 }
  0x33   : > { %s155_s6 = sshll.u32 %s148_s4, 4  ;;  %s964_s5 = scalar_lea.sflag [#allocation3], %s144_s25  ;;  %s960_s6 = int_to_ptr.vmem [resolvable:$true] %s155_s6 }
  0x34   : > { %p955_p11 = pnand %p1146_p10, %p205_p6 }
  0x36   : > { %s1147_s29 = scalar_select %p955_p11, 1, 0 }
  0x37   : > { %s951_s30 = scalar_lea.hbm %s1145_s0, %s892_s26  ;;  %s681_s20 = scalar_lea.hbm %s1145_s0, 2048 }
  0x38   : > { %s676_s7 = scalar_lea.hbm %s951_s30, 512  ;;  %p682_p8 = scmp.lt.u32.totalorder %s951_s30, %s1145_s0 }
  0x39   : > { %p677_p13 = scmp.ne.s32.totalorder %s951_s30, %s676_s7  ;;  %p683_p9 = scmp.lt.u32.totalorder %s681_s20, %s676_s7 }
  0x3a   : > { %p685_p2 = scmp.lt.u32.totalorder %s676_s7, %s951_s30 }
  0x3b   : > { %p679_p3 = pnand %p677_p13, %p919_p1  ;;  %p684_p0 = por %p683_p9, %p682_p8 }
  0x3d   : > { %p680_p7 = pneg %p679_p3  ;;  %p686_p4 = por %p685_p2, %p684_p0 }
  0x3f   : > { %p687_p5 = pnand %p686_p4, %p680_p7 }
  0x41   : > { %690 = shalt.err (!%p687_p5)
}
  0x42   : > { %s691_s25 = scalar_lea.vmem %s960_s6, 512  ;;  %s811_s4 = smov [#allocation2]  }
  0x43   : > { %p692_p6 = scmp.ne.s32.totalorder %s960_s6, %s691_s25  ;;  %s696_s11 = sshll.u32 %s811_s4, 4  ;;  %s697_s11 = int_to_ptr.vmem [resolvable:$false] %s696_s11 }
  0x44   : > { %s698_s9 = scalar_lea.vmem %s697_s11, 1024  ;;  %p699_p3 = scmp.lt.s32.totalorder %s960_s6, %s697_s11 }
  0x45   : > { %p694_p10 = pnand %p692_p6, %p919_p1  ;;  %p700_p11 = scmp.lt.s32.totalorder %s698_s9, %s691_s25 }
  0x47   : > { %p695_p13 = pneg %p694_p10  ;;  %p701_p8 = por %p700_p11, %p699_p3 }
  0x49   : > { %p702_p9 = pnand %p701_p8, %p695_p13 }
  0x4b   : > { %705 = shalt.err (!%p702_p9)
}
  0x4c   : > { %s1148_s17 = smov 8   ;;  %s1149_s7 = smov 128  }
  0x4d   : > { %596 = dma.hbm_to_vmem [thread:$0]  (!%p898_p12), %s951_s30, 512, %s960_s6, %s964_s5, %s1149_s7, %s1149_s7, %s1148_s17  }
  0x4e   : > { %s995_s4 = scalar_lea.hbm %s1131_s2, %s892_s26  ;;  %s190_s25 = scalar_lea.vmem [#allocation7], %s896_s27 }
  0x4f   : > { %s197_s11 = sshll.u32 %s190_s25, 4  ;;  %s706_s9 = scalar_lea.hbm %s995_s4, 512  ;;  %s998_s11 = int_to_ptr.vmem [resolvable:$true] %s197_s11 }
  0x50   : > { %p707_p11 = scmp.ne.s32.totalorder %s995_s4, %s706_s9  ;;  %s711_s6 = scalar_lea.hbm %s1131_s2, 2048 }
  0x51   : > { %p712_p2 = scmp.lt.u32.totalorder %s995_s4, %s1131_s2  ;;  %p713_p4 = scmp.lt.u32.totalorder %s711_s6, %s706_s9 }
  0x52   : > { %p709_p7 = pnand %p707_p11, %p919_p1  ;;  %p715_p6 = scmp.lt.u32.totalorder %s706_s9, %s995_s4 }
  0x53   : > { %p714_p5 = por %p713_p4, %p712_p2 }
  0x54   : > { %p710_p0 = pneg %p709_p7 }
  0x55   : > { %p716_p10 = por %p715_p6, %p714_p5 }
  0x57   : > { %p717_p13 = pnand %p716_p10, %p710_p0 }
  0x59   : > { %720 = shalt.err (!%p717_p13)
}
  0x5a   : > { %s721_s27 = scalar_lea.vmem %s998_s11, 512  ;;  %s812_s0 = smov [#allocation7]  }
  0x5b   : > { %p722_p3 = scmp.ne.s32.totalorder %s998_s11, %s721_s27  ;;  %s726_s19 = sshll.u32 %s812_s0, 4  ;;  %s727_s19 = int_to_ptr.vmem [resolvable:$false] %s726_s19 }
  0x5c   : > { %s728_s20 = scalar_lea.vmem %s727_s19, 1024  ;;  %p729_p11 = scmp.lt.s32.totalorder %s998_s11, %s727_s19 }
  0x5d   : > { %p724_p8 = pnand %p722_p3, %p919_p1  ;;  %p730_p7 = scmp.lt.s32.totalorder %s728_s20, %s721_s27 }
  0x5f   : > { %p725_p9 = pneg %p724_p8  ;;  %p731_p2 = por %p730_p7, %p729_p11 }
  0x61   : > { %p732_p4 = pnand %p731_p2, %p725_p9 }
  0x63   : > { %735 = shalt.err (!%p732_p4)
}
  0x64   : > { %602 = dma.hbm_to_vmem [thread:$0]  (!%p898_p12), %s995_s4, 512, %s998_s11, %s913_s8, %s1149_s7, %s1149_s7, %s1148_s17  }
  0x65   : > { %p1150_p1 = scmp.ne.s32.totalorder %s1147_s29, 0 }
  0x66   : > { %s1028_s10 = sand.u32 (!%p1150_p1), 1, %s798_s13   ;;  %p1151_p0 = scmp.ne.s32.totalorder (!%p1150_p1), %s1140_s22, 0 }
  0x67   : > { %209 = sbr.rel (%p1150_p1) target bundleno = 632 (0x278), region = 32  ;;  %s572_s25 = sshll.u32 (!%p1150_p1), %s1028_s10, 5 }
  0x68   : > { %s212_s9 = scalar_lea.sflag (!%p1150_p1), [#allocation3], %s1028_s10  ;;  %s1032_s30 = scalar_lea.vmem (!%p1150_p1), [#allocation2], %s572_s25 }
  0x6e   : > { %781 = dma.done.wait (%p1151_p0), %s212_s9, 512  }
  0x6f   : > { %783 = vsyncadd (%p1151_p0), %s212_s9, 4294966784  ;;  %s220_s28 = sand.u32 1, %s858_s16   ;;  %s1039_s29 = scalar_lea.vmem [#allocation5], %s572_s25 }
  0x70   : > { %s221_s8 = scalar_lea.sflag [#allocation6], %s220_s28 }
  0x71   : > { %785 = dma.done.wait (%p1151_p0), %s221_s8, 1024  }
  0x72   : > { %787 = vsyncadd (%p1151_p0), %s221_s8, 4294966272  ;;  %v269_v0 = vld [vmem:[%s1032_s30] sm:$0xff]  ;;  %s233_s17 = scalar_lea.vmem [#allocation7], %s572_s25  ;;  %v270_v6 = vld [vmem:[%s1032_s30 + $0x8] sm:$0xff]  ;;  %s813_s22 = smov 64   ;;  %vm301_vm0 = vcmask 261120  }
  0x73   : > { %v273_v1 = vld [vmem:[%s1039_s29] sm:$0xff]  ;;  %v289_v5 = vmul.f32 2.0, %v269_v0  ;;  %v274_v7 = vld [vmem:[%s1039_s29 + $0x8] sm:$0xff]  ;;  %v290_v10 = vmul.f32 2.0, %v270_v6  ;;  %v271_v11 = vld [vmem:[%s1032_s30 + $0x10] sm:$0xff]  ;;  %s814_s7 = smov 96  }
  0x74   : > { %v277_v2 = vld [vmem:[%s233_s17] sm:$0xff]  ;;  %v278_v8 = vld [vmem:[%s233_s17 + $0x8] sm:$0xff]  ;;  %v275_v12 = vld [vmem:[%s1039_s29 + $0x10] sm:$0xff]  ;;  %v291_v17 = vmul.f32 2.0, %v271_v11  ;;  %s815_s4 = smov 32   ;;  %vm390_vm1 = vcmask 7168  }
  0x75   : > { %v281_v3 = vsub.f32 %v273_v1, %v277_v2  ;;  %v285_v4 = vadd.f32 %v277_v2, %v273_v1  ;;  %v286_v9 = vadd.f32 %v278_v8, %v274_v7  ;;  %v279_v13 = vld [vmem:[%s233_s17 + $0x10] sm:$0xff]  ;;  %v282_v15 = vsub.f32 %v274_v7, %v278_v8  ;;  %v272_v23 = vld [vmem:[%s1032_s30 + $0x18] sm:$0xff]  ;;  %s575_s11 = sshll.u32 %s1028_s10, 3  ;;  %s577_s26 = sshll.u32 %s858_s16, 7 }
  0x76   : > { %v287_v16 = vadd.f32 %v279_v13, %v275_v12  ;;  %v283_v21 = vsub.f32 %v275_v12, %v279_v13  ;;  %v276_v24 = vld [vmem:[%s1039_s29 + $0x18] sm:$0xff]  ;;  %v292_v28 = vmul.f32 2.0, %v272_v23  ;;  %vm395_vm2 = vcmask 15360   ;;  %s265_s6 = scalar_lea.vmem [#allocation8], %s575_s11  ;;  %s1088_s20 = scalar_lea.hbm %s1132_s3, %s577_s26 }
  0x77   : > { %v293_v14 = vsub.f32 %v285_v4, %v289_v5  ;;  %v294_v18 = vsub.f32 %v286_v9, %v290_v10  ;;  %v280_v25 = vld [vmem:[%s233_s17 + $0x18] sm:$0xff]  ;;  %vm400_vm3 = vcmask 23552   ;;  %vm413_vm4 = vcmask 31744   ;;  %s446_s5 = sshll.u32 %s265_s6, 4  ;;  %s433_s25 = scalar_lea.sflag [#allocation4], %s1028_s10  ;;  %s1083_s5 = int_to_ptr.vmem [resolvable:$true] %s446_s5 }
  0x78   : > { %v295_v22 = vsub.f32 %v287_v16, %v291_v17  ;;  %v288_v27 = vadd.f32 %v280_v25, %v276_v24  ;;  %v284_v29 = vsub.f32 %v276_v24, %v280_v25  ;;  %s736_s9 = scalar_lea.vmem %s1083_s5, 128  ;;  %p1152_p5 = scmp.ne.s32.totalorder %s1141_s23, 0 }
  0x79   : > { %v297_v19 = vmul.f32 %v293_v14, %v281_v3  ;;  %v298_v20 = vmul.f32 %v294_v18, %v282_v15  ;;  %p737_p12 = scmp.ne.s32.totalorder %s1083_s5, %s736_s9  ;;  %s816_s16 = smov [#allocation8]  }
  0x7a   : > { %v299_v26 = vmul.f32 %v295_v22, %v283_v21  ;;  %v296_v30 = vsub.f32 %v288_v27, %v292_v28  ;;  %s740_s30 = sshll.u32 %s816_s16, 4  ;;  %s741_s30 = int_to_ptr.vmem [resolvable:$false] %s740_s30 }
  0x7b   : > { %342 = vrot.lane.b32.xlu1 %v297_v19, %s813_s22  ;;  %318 = vrot.lane.b32.xlu0 %v297_v19, %s814_s7  ;;  %v302_v32 = vsel %vm301_vm0, %v297_v19, 0.0  ;;  %v305_v34 = vsel %vm301_vm0, %v298_v20, 0.0  ;;  %p738_p6 = pnand %p737_p12, %p1152_p5  ;;  %s742_s28 = scalar_lea.vmem %s741_s30, 256 }
  0x7c   : > { %v300_v31 = vmul.f32 %v296_v30, %v284_v29  ;;  %v308_v35 = vsel %vm301_vm0, %v299_v26, 0.0  ;;  %p743_p13 = scmp.lt.s32.totalorder %s1083_s5, %s741_s30  ;;  %p744_p3 = scmp.lt.s32.totalorder %s742_s28, %s736_s9 }
  0x7d   : > { %p739_p10 = pneg %p738_p6 }
  0x7e   : > { %v311_v33 = vsel %vm301_vm0, %v300_v31, 0.0  ;;  %p745_p8 = por %p744_p3, %p743_p13 }
  0x7f   : > { %344 = vrot.lane.b32.xlu1 %v298_v20, %s813_s22  ;;  %320 = vrot.lane.b32.xlu0 %v298_v20, %s814_s7 }
  0x80   : > { %p746_p9 = pnand %p745_p8, %p739_p10 }
  0x83   : > { %366 = vrot.lane.b32.xlu1 %v297_v19, %s815_s4  ;;  %322 = vrot.lane.b32.xlu0 %v299_v26, %s814_s7 }
  0x87   : > { %346 = vrot.lane.b32.xlu1 %v299_v26, %s813_s22  ;;  %368 = vrot.lane.b32.xlu0 %v298_v20, %s815_s4 }
  0x8b   : > { %324 = vrot.lane.b32.xlu0 %v300_v31, %s814_s7  ;;  %370 = vrot.lane.b32.xlu1 %v299_v26, %s815_s4 }
  0x8f   : > { %348 = vrot.lane.b32.xlu0 %v300_v31, %s813_s22  ;;  %372 = vrot.lane.b32.xlu1 %v300_v31, %s815_s4 }
  0xae   : > { %303 = vadd.xlane.f32.xlu0 %v302_v32 }
  0xb2   : > { %312 = vadd.xlane.f32.xlu0 %v311_v33 }
  0xb3   : > { %306 = vadd.xlane.f32.xlu1 %v305_v34 }
  0xb7   : > { %309 = vadd.xlane.f32.xlu1 %v308_v35 }
  0xed   : > { %v343_v36 = vpop.permute.xlu1 %342  ;;  %v319_v37 = vpop.permute.xlu0 %318 }
  0xee   : > { %v330_v38 = vsel %vm301_vm0, %v319_v37, 0.0  ;;  %v354_v39 = vsel %vm301_vm0, %v343_v36, 0.0 }
  0xef   : > { %331 = vadd.xlane.f32.xlu0 %v330_v38  ;;  %355 = vadd.xlane.f32.xlu1 %v354_v39 }
  0xf1   : > { %v345_v40 = vpop.permute.xlu1 %344  ;;  %v321_v41 = vpop.permute.xlu0 %320 }
  0xf2   : > { %v333_v42 = vsel %vm301_vm0, %v321_v41, 0.0  ;;  %v357_v43 = vsel %vm301_vm0, %v345_v40, 0.0 }
  0xf3   : > { %334 = vadd.xlane.f32.xlu0 %v333_v42 }
  0xf5   : > { %v367_v44 = vpop.permute.xlu1 %366  ;;  %v323_v45 = vpop.permute.xlu0 %322 }
  0xf6   : > { %v378_v46 = vsel %vm301_vm0, %v367_v44, 0.0  ;;  %v336_v47 = vsel %vm301_vm0, %v323_v45, 0.0 }
  0xf7   : > { %379 = vadd.xlane.f32.xlu1 %v378_v46  ;;  %358 = vadd.xlane.f32.xlu0 %v357_v43 }
  0xf9   : > { %v347_v48 = vpop.permute.xlu1 %346  ;;  %v369_v49 = vpop.permute.xlu0 %368 }
  0xfa   : > { %v360_v50 = vsel %vm301_vm0, %v347_v48, 0.0  ;;  %v381_v51 = vsel %vm301_vm0, %v369_v49, 0.0 }
  0xfb   : > { %361 = vadd.xlane.f32.xlu1 %v360_v50  ;;  %337 = vadd.xlane.f32.xlu0 %v336_v47 }
  0xfd   : > { %v325_v52 = vpop.permute.xlu0 %324  ;;  %v371_v53 = vpop.permute.xlu1 %370 }
  0xfe   : > { %v339_v54 = vsel %vm301_vm0, %v325_v52, 0.0  ;;  %v384_v55 = vsel %vm301_vm0, %v371_v53, 0.0 }
  0xff   : > { %340 = vadd.xlane.f32.xlu1 %v339_v54  ;;  %382 = vadd.xlane.f32.xlu0 %v381_v51 }
 0x101   : > { %v349_v56 = vpop.permute.xlu0 %348  ;;  %v373_v57 = vpop.permute.xlu1 %372 }
 0x102   : > { %v363_v58 = vsel %vm301_vm0, %v349_v56, 0.0  ;;  %v387_v59 = vsel %vm301_vm0, %v373_v57, 0.0 }
 0x103   : > { %364 = vadd.xlane.f32.xlu1 %v363_v58  ;;  %385 = vadd.xlane.f32.xlu0 %v384_v55 }
 0x107   : > { %388 = vadd.xlane.f32.xlu0 %v387_v59 }
 0x13b   : > { %v304_v60 = vpop.xlane.xlu0 %303 }
 0x13f   : > { %v313_v62 = vpop.xlane.xlu0 %312 }
 0x140   : > { %v307_v61 = vpop.xlane.xlu1 %306 }
 0x144   : > { %v310_v63 = vpop.xlane.xlu1 %309 }
 0x17c   : > { %v332_v0 = vpop.xlane.xlu0 %331  ;;  %v356_v1 = vpop.xlane.xlu1 %355 }
 0x17d   : > { %v391_v5 = vsel %vm390_vm1, %v304_v60, %v332_v0 }
 0x17e   : > { %v396_v8 = vsel %vm395_vm2, %v391_v5, %v356_v1 }
 0x180   : > { %v335_v2 = vpop.xlane.xlu0 %334 }
 0x181   : > { %v392_v9 = vsel %vm390_vm1, %v307_v61, %v335_v2 }
 0x184   : > { %v380_v3 = vpop.xlane.xlu1 %379  ;;  %v359_v4 = vpop.xlane.xlu0 %358 }
 0x185   : > { %v401_v10 = vsel %vm400_vm3, %v396_v8, %v380_v3  ;;  %v397_v11 = vsel %vm395_vm2, %v392_v9, %v359_v4 }
 0x186   : > { %v405_v16 = vadd.f32 1.0, %v401_v10 }
 0x188   : > { %v362_v6 = vpop.xlane.xlu1 %361  ;;  %v338_v7 = vpop.xlane.xlu0 %337  ;;  %v409_v23 = vmax.f32 %v405_v16, 0.0 }
 0x189   : > { %v393_v14 = vsel %vm390_vm1, %v310_v63, %v338_v7 }
 0x18a   : > { %v398_v19 = vsel %vm395_vm2, %v393_v14, %v362_v6  ;;  %v414_v31 = vsel %vm413_vm4, %v409_v23, 0.0 }
 0x18c   : > { %v341_v12 = vpop.xlane.xlu1 %340  ;;  %v383_v13 = vpop.xlane.xlu0 %382 }
 0x18d   : > { %v402_v15 = vsel %vm400_vm3, %v397_v11, %v383_v13  ;;  %v394_v25 = vsel %vm390_vm1, %v313_v62, %v341_v12 }
 0x18e   : > { %v406_v17 = vadd.f32 1.0, %v402_v15 }
 0x190   : > { %v410_v18 = vmax.f32 %v406_v17, 0.0  ;;  %v386_v20 = vpop.xlane.xlu0 %385  ;;  %v365_v21 = vpop.xlane.xlu1 %364 }
 0x191   : > { %v403_v22 = vsel %vm400_vm3, %v398_v19, %v386_v20  ;;  %v399_v27 = vsel %vm395_vm2, %v394_v25, %v365_v21 }
 0x192   : > { %v407_v24 = vadd.f32 1.0, %v403_v22  ;;  %v415_v26 = vsel %vm413_vm4, %v410_v18, 0.0 }
 0x193   : > { %v416_v34 = vadd.f32 %v415_v26, %v414_v31 }
 0x194   : > { %v411_v28 = vmax.f32 %v407_v24, 0.0  ;;  %v389_v29 = vpop.xlane.xlu0 %388 }
 0x195   : > { %v404_v30 = vsel %vm400_vm3, %v399_v27, %v389_v29 }
 0x196   : > { %v408_v32 = vadd.f32 1.0, %v404_v30  ;;  %v417_v33 = vsel %vm413_vm4, %v411_v28, 0.0 }
 0x197   : > { %v418_v36 = vadd.f32 %v417_v33, %v416_v34 }
 0x198   : > { %v412_v35 = vmax.f32 %v408_v32, 0.0 }
 0x19a   : > { %v419_v37 = vsel %vm413_vm4, %v412_v35, 0.0 }
 0x19b   : > { %v420_v38 = vadd.f32 %v419_v37, %v418_v36 }
 0x19d   : > { %421 = vadd.xlane.f32.xlu1 %v420_v38 }
 0x22a   : > { %v422_v39 = vpop.xlane.xlu1 %421 }
 0x22b   : > { %v423_v40 = vrot.slane %v422_v39, 4 }
 0x22d   : > { %v424_v41 = vadd.f32 %v423_v40, %v422_v39 }
 0x22f   : > { %v425_v42 = vrot.slane %v424_v41, 2 }
 0x231   : > { %v426_v43 = vadd.f32 %v425_v42, %v424_v41 }
 0x233   : > { %v427_v44 = vrot.slane %v426_v43, 1 }
 0x235   : > { %v428_v45 = vadd.f32 %v427_v44, %v426_v43 }
 0x237   : > { %583 = vpush %v428_v45 }
 0x268   : > { %s584_s27 = spop %583 }
 0x269   : > { %v430_v46 = vstv %s584_s27 }
 0x26a   : > { %431 = vst [vmem:[%s265_s6] sm:$0xff] %v430_v46 }
 0x26b   : > { %749 = shalt.err (!%p746_p9)
}
 0x26c   : > { %s750_s10 = scalar_lea.hbm %s1088_s20, 128  ;;  %s754_s17 = scalar_lea.hbm %s1132_s3, 512 }
 0x26d   : > { %p751_p11 = scmp.ne.s32.totalorder %s1088_s20, %s750_s10  ;;  %p755_p4 = scmp.lt.u32.totalorder %s1088_s20, %s1132_s3 }
 0x26e   : > { %p756_p1 = scmp.lt.u32.totalorder %s754_s17, %s750_s10  ;;  %p758_p12 = scmp.lt.u32.totalorder %s750_s10, %s1088_s20 }
 0x26f   : > { %p752_p7 = pnand %p751_p11, %p1152_p5 }
 0x270   : > { %p757_p0 = por %p756_p1, %p755_p4 }
 0x271   : > { %p753_p2 = pneg %p752_p7 }
 0x272   : > { %p759_p6 = por %p758_p12, %p757_p0 }
 0x274   : > { %p760_p10 = pnand %p759_p6, %p753_p2 }
 0x276   : > { %763 = shalt.err (!%p760_p10)
}
 0x277   : > { %591 = dma.vmem_to_hbm [thread:$0]  (%p1152_p5), %s1083_s5, 128, %s1088_s20, %s433_s25  }
 0x278 PF: > { %p608_p13 = scmp.ge.s32.totalorder %s806_s15, 2  ;;  %s458_s4 = sand.u32 1, %s794_s12  }
 0x279   : > { %p1153_p3 = scmp.ne.s32.totalorder %s1142_s24, 0  ;;  %s459_s11 = scalar_lea.sflag [#allocation4], %s458_s4 }
 0x27b   : > { %p604_p8 = pnand %p608_p13, %p1153_p3 }
 0x27d   : > { %789 = dma.done.wait (!%p604_p8), %s459_s11, 128  }
 0x27e   : > { %791 = vsyncadd (!%p604_p8), %s459_s11, 4294967168  ;;  %p19_p9 = scmp.ge.s32.totalorder %s862_s18, 6   ;;  %s1154_s12 = smov %s798_s13 }
 0x27f   : > { %s1155_s13 = smov %s802_s14  ;;  %s1156_s14 = smov %s874_s21 }
 0x280   : > { %s1157_s15 = smov %s862_s18  ;;  %21 = sbr.rel (!%p19_p9) target bundleno = 9 (0x9), region = 101 }
 0x287   :  { %464 = vsyncpa [#allocation3], 1 }
 0x288   :  { %466 = vsyncpa [#allocation3 + $0x1], 1 }
 0x289   :  { %467 = vsyncpa [#allocation6], 1 }
 0x28a   :  { %469 = vsyncpa [#allocation6 + $0x1], 1 }
 0x28b   :  { %470 = vsyncpa [#allocation4], 1 }
 0x28c   :  { %472 = vsyncpa [#allocation4 + $0x1], 1 }

</bundles_post_ra>
